<compile_context>
chip_gen: v7x
topology: tpu7x:2x2x1
jax: 0.10.0
libtpu: 0.0.40
codegen_flags: <defaults>
</compile_context>

<pallas_src>
import jax
import jax.numpy as jnp
from jax import lax
from jax.experimental import pallas as pl
from jax.experimental.pallas import tpu as pltpu

LANES = 128          # vreg lane width; last dim of every block
SUBLANES = 8         # f32 sublane granularity
MAX_ROW_TILE = 2048  # 2048 x 128 x 4 B = 1 MiB per f32 block


def _rsample_kernel(loc_ref, logvar_ref, eps_ref, out_ref):
    """out = loc + exp(0.5 * log_var) * eps for one (row_tile, 128) block."""
    mu = loc_ref[...].astype(jnp.float32)
    scale = jnp.exp(0.5 * logvar_ref[...].astype(jnp.float32))
    eps = eps_ref[...].astype(jnp.float32)
    out_ref[...] = (mu + scale * eps).astype(out_ref.dtype)


def normal_forward(x, seed=0, params_dim=-1):
    """Pallas forward of the `Normal` module: rsample of N(loc, exp(0.5 * log_var))."""
    axis = params_dim if params_dim >= 0 else params_dim + x.ndim
    if x.shape[axis] != 2:
        raise ValueError(f"expected size 2 along params_dim={params_dim}, got {x.shape[axis]}")

    # torch.split(1, dim=params_dim) -> loc, log_var, each keeping a size-1 params dim.
    loc = lax.slice_in_dim(x, 0, 1, axis=axis)
    log_var = lax.slice_in_dim(x, 1, 2, axis=axis)
    out_nd_shape = loc.shape
    n = loc.size

    # Lane-dense [M, 128] slab; M rounded up to a sublane multiple.  For aligned sizes
    # (like the demo shape) this is a pure reshape — no padded HBM copy is materialized.
    m_rows = -(-n // LANES)
    m_rows = -(-m_rows // SUBLANES) * SUBLANES
    padded = m_rows * LANES
    loc_flat = loc.reshape(-1)
    lv_flat = log_var.reshape(-1)
    if padded != n:
        loc_flat = jnp.pad(loc_flat, (0, padded - n))
        lv_flat = jnp.pad(lv_flat, (0, padded - n))
    loc2d = loc_flat.reshape(m_rows, LANES)
    lv2d = lv_flat.reshape(m_rows, LANES)

    # Reparameterization noise: exactly N(0,1), deterministic for a fixed seed.
    eps2d = jax.random.normal(jax.random.PRNGKey(seed), (m_rows, LANES), dtype=jnp.float32)

    row_tile = min(MAX_ROW_TILE, m_rows)          # always a multiple of 8
    grid = (pl.cdiv(m_rows, row_tile),)

    out2d = pl.pallas_call(
        _rsample_kernel,
        out_shape=jax.ShapeDtypeStruct((m_rows, LANES), x.dtype),
        grid_spec=pltpu.PrefetchScalarGridSpec(
            num_scalar_prefetch=0,
            grid=grid,
            in_specs=[
                pl.BlockSpec((row_tile, LANES), lambda i: (i, 0)),
                pl.BlockSpec((row_tile, LANES), lambda i: (i, 0)),
                pl.BlockSpec((row_tile, LANES), lambda i: (i, 0)),
            ],
            out_specs=pl.BlockSpec((row_tile, LANES), lambda i: (i, 0)),
        ),
        compiler_params=pltpu.CompilerParams(
            # Pure elementwise map (no accumulator): every tile is independent, so the
            # single grid axis is parallel and both v7x TensorCores get their own tiles.
            dimension_semantics=("parallel",),
        ),
    )(loc2d, lv2d, eps2d)

    return out2d.reshape(-1)[:n].reshape(out_nd_shape)


if __name__ == "__main__":
    key = jax.random.PRNGKey(0)
    # batch=2, channels=4, 16x16 spatial, last dim = 2 params (loc, log_var) as the forward implies.
    shape = (2, 4, 16, 16, 2)
    x = jax.random.normal(key, shape, dtype=jnp.float32)

    out = jax.block_until_ready(normal_forward(x, seed=0))
    assert out.shape == (2, 4, 16, 16, 1), out.shape
    assert out.dtype == x.dtype
    assert bool(jnp.all(jnp.isfinite(out)))

    # Deterministic for a fixed seed.
    out2 = jax.block_until_ready(normal_forward(x, seed=0))
    assert bool(jnp.array_equal(out, out2))

    # (out - loc) / scale should be (approximately) standard normal.
    loc = x[..., 0:1]
    log_var = x[..., 1:2]
    scale = jnp.exp(0.5 * log_var)
    eps = (out.astype(jnp.float32) - loc) / scale
    eps_mean = float(jnp.mean(eps))
    eps_std = float(jnp.std(eps))
    assert abs(eps_mean) < 0.25, eps_mean
    assert 0.75 < eps_std < 1.25, eps_std
    assert float(jnp.max(jnp.abs(eps))) < 10.0

    # Near-deterministic limit: log_var -> -40 gives scale ~ 2e-9, so output ≈ loc.
    x_det = x.at[..., 1].set(-40.0)
    out_det = jax.block_until_ready(normal_forward(x_det, seed=0))
    assert bool(jnp.allclose(out_det, x_det[..., 0:1], atol=1e-5))

    print("KERNEL_OK")
</pallas_src>

<mosaic_0001>
module attributes {stable_mosaic.version = 11 : i64} {
  func.func @_rsample_kernel(%arg0: i32, %arg1: memref<16x128xf32, #tpu.memory_space<vmem>>, %arg2: memref<16x128xf32, #tpu.memory_space<vmem>>, %arg3: memref<16x128xf32, #tpu.memory_space<vmem>>, %arg4: memref<16x128xf32, #tpu.memory_space<vmem>>) attributes {dimension_semantics = [#tpu.dimension_semantics<parallel>], iteration_bounds = array<i64: 1>, scalar_prefetch = 0 : i64, scratch_operands = 0 : i64, tpu.core_type = #tpu.core_type<tc>, window_params = [{transform_indices = @transform_0, window_bounds = array<i64: 16, 128>}, {transform_indices = @transform_1, window_bounds = array<i64: 16, 128>}, {transform_indices = @transform_2, window_bounds = array<i64: 16, 128>}, {transform_indices = @transform_3, window_bounds = array<i64: 16, 128>}]} {
    %c0 = arith.constant 0 : index
    %c0_0 = arith.constant 0 : index
    %0 = vector.load %arg1[%c0, %c0_0] : memref<16x128xf32, #tpu.memory_space<vmem>>, vector<16x128xf32>
    %c0_1 = arith.constant 0 : index
    %c0_2 = arith.constant 0 : index
    %1 = vector.load %arg2[%c0_1, %c0_2] : memref<16x128xf32, #tpu.memory_space<vmem>>, vector<16x128xf32>
    %cst = arith.constant 5.000000e-01 : f32
    %2 = vector.broadcast %cst : f32 to vector<16x128xf32>
    %3 = arith.mulf %2, %1 : vector<16x128xf32>
    %4 = math.exp %3 : vector<16x128xf32>
    %c0_3 = arith.constant 0 : index
    %c0_4 = arith.constant 0 : index
    %5 = vector.load %arg3[%c0_3, %c0_4] : memref<16x128xf32, #tpu.memory_space<vmem>>, vector<16x128xf32>
    %6 = arith.mulf %4, %5 : vector<16x128xf32>
    %7 = arith.addf %0, %6 : vector<16x128xf32>
    %c0_5 = arith.constant 0 : index
    %c0_6 = arith.constant 0 : index
    %8 = vector.load %arg4[%c0_5, %c0_6] : memref<16x128xf32, #tpu.memory_space<vmem>>, vector<16x128xf32>
    tpu.vector_store %arg4[%c0_5, %c0_6], %7 {strides = array<i32>} : memref<16x128xf32, #tpu.memory_space<vmem>>, vector<16x128xf32>,
    return
  }
  func.func @transform_0(%arg0: i32) -> (i32, i32) {
    %c0_i32 = arith.constant 0 : i32
    %c0_i32_0 = arith.constant 0 : i32
    return %arg0, %c0_i32 : i32, i32
  }
  func.func @transform_1(%arg0: i32) -> (i32, i32) {
    %c0_i32 = arith.constant 0 : i32
    %c0_i32_0 = arith.constant 0 : i32
    return %arg0, %c0_i32 : i32, i32
  }
  func.func @transform_2(%arg0: i32) -> (i32, i32) {
    %c0_i32 = arith.constant 0 : i32
    %c0_i32_0 = arith.constant 0 : i32
    return %arg0, %c0_i32 : i32, i32
  }
  func.func @transform_3(%arg0: i32) -> (i32, i32) {
    %c0_i32 = arith.constant 0 : i32
    %c0_i32_0 = arith.constant 0 : i32
    return %arg0, %c0_i32 : i32, i32
  }
}

</mosaic_0001>

<bundles_post_ra>
// kernel: tpu_custom_call.1
= control target key start
LH: loop header
LB: loop body
LE: loop exit
PB: predicated region body
PF: predicated region fallthrough
CT: control target
= control target key end

     0   :  { %8 = vsyncpa [#allocation3], 0  ;;  %s289_s0 = inlined_call_operand.hbm [shape: f32[16,128], index: 0, kind: input, shape index: {}]   ;;  %s290_s1 = inlined_call_operand.hbm [shape: f32[16,128], index: 1, kind: input, shape index: {}]   ;;  %s291_s2 = inlined_call_operand.hbm [shape: f32[16,128], index: 2, kind: input, shape index: {}]   ;;  %s292_s3 = inlined_call_operand.hbm [shape: f32[16,128], index: 3, kind: output, shape index: {}]  }
   0x1   :  { %9 = vsyncpa [#allocation6], 0 }
   0x2   :  { %10 = vsyncpa [#allocation4], 0  ;;  %s196_s12 = smov [#allocation5]   ;;  %s197_s14 = smov [#allocation2]  }
   0x3   :  { %s28_s13 = sshll.u32 %s196_s12, 4  ;;  %s16_s15 = sshll.u32 %s197_s14, 4  ;;  %s29_s13 = int_to_ptr.vmem [resolvable:$true] %s28_s13  ;;  %s222_s15 = int_to_ptr.vmem [resolvable:$true] %s16_s15 }
   0x4   :  { %s102_s18 = scalar_lea.hbm %s290_s1, 256 }
   0x5   :  { %p103_p0 = scmp.ne.s32.totalorder %s290_s1, %s102_s18  ;;  %p106_p1 = scmp.lt.u32.totalorder %s102_s18, %s290_s1 }
   0x7   :  { %p108_p2 = pnand %p106_p1, %p103_p0 }
   0x9   :  { %111 = shalt.err (!%p108_p2)
}
   0xa   :  { %s112_s23 = scalar_lea.vmem %s29_s13, 256  ;;  %p117_p4 = scmp.lt.s32.totalorder %s29_s13, %s29_s13 }
   0xb   :  { %p113_p3 = scmp.ne.s32.totalorder %s29_s13, %s112_s23  ;;  %p118_p5 = scmp.lt.s32.totalorder %s112_s23, %s112_s23 }
   0xd   :  { %p119_p6 = por %p118_p5, %p117_p4 }
   0xf   :  { %p120_p7 = pnand %p119_p6, %p113_p3 }
  0x11   :  { %123 = shalt.err (!%p120_p7)
}
  0x12   :  { %s198_s24 = smov 128   ;;  %s199_s25 = smov 8  }
  0x13   :  { %34 = dma.hbm_to_vmem [thread:$0]  %s290_s1, 256, %s29_s13, [#allocation6], %s198_s24, %s198_s24, %s199_s25  }
  0x14   :  { %s124_s30 = scalar_lea.hbm %s289_s0, 256 }
  0x15   :  { %p125_p8 = scmp.ne.s32.totalorder %s289_s0, %s124_s30  ;;  %p128_p9 = scmp.lt.u32.totalorder %s124_s30, %s289_s0 }
  0x17   :  { %p130_p10 = pnand %p128_p9, %p125_p8 }
  0x19   :  { %133 = shalt.err (!%p130_p10)
}
  0x1a   :  { %s134_s8 = scalar_lea.vmem %s222_s15, 256  ;;  %p139_p12 = scmp.lt.s32.totalorder %s222_s15, %s222_s15 }
  0x1b   :  { %p135_p11 = scmp.ne.s32.totalorder %s222_s15, %s134_s8  ;;  %p140_p13 = scmp.lt.s32.totalorder %s134_s8, %s134_s8 }
  0x1d   :  { %p141_p0 = por %p140_p13, %p139_p12 }
  0x1f   :  { %p142_p1 = pnand %p141_p0, %p135_p11 }
  0x21   :  { %145 = shalt.err (!%p142_p1)
}
  0x22   :  { %22 = dma.hbm_to_vmem [thread:$0]  %s289_s0, 256, %s222_s15, [#allocation3], %s198_s24, %s198_s24, %s199_s25  }
  0x23   :  { %s200_s10 = smov [#allocation7]   ;;  %s146_s14 = scalar_lea.hbm %s291_s2, 256 }
  0x24   :  { %s40_s11 = sshll.u32 %s200_s10, 4  ;;  %p147_p2 = scmp.ne.s32.totalorder %s291_s2, %s146_s14  ;;  %s41_s11 = int_to_ptr.vmem [resolvable:$true] %s40_s11 }
  0x25   :  { %p150_p3 = scmp.lt.u32.totalorder %s146_s14, %s291_s2 }
  0x27   :  { %p152_p4 = pnand %p150_p3, %p147_p2 }
  0x29   :  { %155 = shalt.err (!%p152_p4)
}
  0x2a   :  { %s156_s20 = scalar_lea.vmem %s41_s11, 256  ;;  %p161_p6 = scmp.lt.s32.totalorder %s41_s11, %s41_s11 }
  0x2b   :  { %p157_p5 = scmp.ne.s32.totalorder %s41_s11, %s156_s20  ;;  %p162_p7 = scmp.lt.s32.totalorder %s156_s20, %s156_s20 }
  0x2d   :  { %p163_p8 = por %p162_p7, %p161_p6 }
  0x2f   :  { %p164_p9 = pnand %p163_p8, %p157_p5 }
  0x31   :  { %167 = shalt.err (!%p164_p9)
}
  0x32   :  { %46 = dma.hbm_to_vmem [thread:$0]  %s291_s2, 256, %s41_s11, [#allocation6], %s198_s24, %s198_s24, %s199_s25  }
  0x33   :  { %190 = dma.done.wait [#allocation3], 256  }
  0x34   :  { %191 = vsyncadd [#allocation3], 4294967040 }
  0x35   :  { %192 = dma.done.wait [#allocation6], 512  }
  0x36   :  { %193 = vsyncadd [#allocation6], 4294966784  ;;  %v58_v0 = vld [vmem:[#allocation5] sm:$0xff]  ;;  %v59_v2 = vld [vmem:[#allocation5 + $0x8] sm:$0xff]  ;;  %s201_s2 = smov [#allocation8]  }
  0x37   :  { %v60_v1 = vmul.f32 0.5, %v58_v0  ;;  %v61_v3 = vmul.f32 0.5, %v59_v2  ;;  %v66_v6 = vld [vmem:[#allocation7] sm:$0xff]  ;;  %v67_v7 = vld [vmem:[#allocation7 + $0x8] sm:$0xff]  ;;  %s79_s21 = sshll.u32 %s201_s2, 4  ;;  %s80_s21 = int_to_ptr.vmem [resolvable:$true] %s79_s21 }
  0x38   :  { %v56_v9 = vld [vmem:[#allocation2] sm:$0xff]  ;;  %v57_v12 = vld [vmem:[#allocation2 + $0x8] sm:$0xff]  ;;  %s168_s22 = scalar_lea.vmem %s80_s21, 256  ;;  %p173_p11 = scmp.lt.s32.totalorder %s80_s21, %s80_s21 }
  0x39   :  { %v62_v4 = vmul.f32 1.442695, %v60_v1  ;;  %v64_v5 = vmul.f32 1.442695, %v61_v3  ;;  %p169_p10 = scmp.ne.s32.totalorder %s80_s21, %s168_s22  ;;  %p174_p12 = scmp.lt.s32.totalorder %s168_s22, %s168_s22 }
  0x3b   :  { %98 = vpow2.f32 %v62_v4  ;;  %p175_p13 = por %p174_p12, %p173_p11 }
  0x3c   :  { %100 = vpow2.f32 %v64_v5 }
  0x3d   :  { %p176_p0 = pnand %p175_p13, %p169_p10 }
  0x45   :  { %v99_v8 = vpop.eup %98 }
  0x46   :  { %v101_v10 = vpop.eup %100  ;;  %v68_v11 = vmul.f32 %v99_v8, %v66_v6 }
  0x47   :  { %v69_v13 = vmul.f32 %v101_v10, %v67_v7 }
  0x48   :  { %v70_v14 = vadd.f32 %v68_v11, %v56_v9 }
  0x49   :  { %v71_v15 = vadd.f32 %v69_v13, %v57_v12 }
  0x4a   :  { %72 = vst [vmem:[#allocation8] sm:$0xff] %v70_v14 }
  0x4b   :  { %73 = vst [vmem:[#allocation8 + $0x8] sm:$0xff] %v71_v15 }
  0x4c   :  { %179 = shalt.err (!%p176_p0)
}
  0x4d   :  { %s180_s27 = scalar_lea.hbm %s292_s3, 256 }
  0x4e   :  { %p181_p1 = scmp.ne.s32.totalorder %s292_s3, %s180_s27  ;;  %p184_p2 = scmp.lt.u32.totalorder %s180_s27, %s292_s3 }
  0x50   :  { %p186_p3 = pnand %p184_p2, %p181_p1 }
  0x52   :  { %189 = shalt.err (!%p186_p3)
}
  0x53   :  { %85 = dma.vmem_to_hbm [thread:$0]  %s80_s21, 256, %s292_s3, [#allocation4], %s198_s24, %s198_s24, %s199_s25  }
  0x54   :  { %194 = dma.done.wait [#allocation4], 256  }
  0x55   :  { %195 = vsyncadd [#allocation4], 4294967040 }
  0x56   :  { %89 = vsyncpa [#allocation3], 1 }
  0x57   :  { %90 = vsyncpa [#allocation6], 1 }
  0x58   :  { %91 = vsyncpa [#allocation4], 1 }

</bundles_post_ra>
